<compile_context>
chip_gen: v7x
topology: tpu7x:2x2x1
jax: 0.10.0
libtpu: 0.0.40
codegen_flags: <defaults>
</compile_context>

<pallas_src>
import functools

import jax
import jax.numpy as jnp
from jax import lax
from jax.experimental import pallas as pl
from jax.experimental.pallas import tpu as pltpu


def _round_up(n, m):
    return ((n + m - 1) // m) * m


def _cdiv(a, b):
    return (a + b - 1) // b


def fuzzy_forward_kernel(z_ref, q_ref, w_ref, repx_ref, sel_ref, out_ref, *,
                         bf16_defuzz):
    """One batch tile of the fuzzy-inference forward.

    z_ref:    (TB, Kq)  streamed augmented inputs [x*x | x | 1 | 0-pad]
    q_ref:    (Kq, Rp)  fused quadratic-form weights (pre-scaled by -0.5; per-rule
                        constant folded into the '1' row; -1e30 for padded rules)
    w_ref:    (Rp, Cp)  consequent weights, column c = o*(A+1)+a holds rho[o, r, a]
                        (bias at a == A)
    repx_ref: (Kq, Cp)  0/1 replication matrix building xrep from z
    sel_ref:  (Cp, Op)  0/1 per-output group-sum / scatter matrix
    out_ref:  (TB, Op)  padded outputs (single lane-dense store)
    """
    f32 = jnp.float32
    z = z_ref[...]                                                     # (TB, Kq)

    # --- membership + Product t-norm path (cancellation sensitive -> f32) ---
    # q[b,r] = -0.5 * sum_a ((x[b,a]-mu[r,a]) / sigma[r,a])^2 ; padded rules -> -1e30
    q = jnp.dot(z, q_ref[...], preferred_element_type=f32,
                precision=lax.Precision.HIGHEST)                       # (TB, Rp)
    firings = jnp.exp(q)                                               # padded -> 0
    inv = pl.reciprocal(jnp.sum(firings, axis=1, keepdims=True) + 1e-20,
                        approx=False)
    norm = firings * inv                                               # (TB, Rp)

    # --- defuzzify path: heavy contraction is K = Rp ---
    if bf16_defuzz:
        cdt, prec = jnp.bfloat16, None          # single-pass bf16 MXU, f32 accumulate
    else:
        cdt, prec = f32, lax.Precision.HIGHEST  # tight-verification mode
    s = jnp.dot(norm.astype(cdt), w_ref[...],
                preferred_element_type=f32, precision=prec)            # (TB, Cp)
    xrep = jnp.dot(z.astype(cdt), repx_ref[...],
                   preferred_element_type=f32, precision=prec)         # (TB, Cp)
    out_ref[...] = jnp.dot((s * xrep).astype(cdt), sel_ref[...],
                           preferred_element_type=f32, precision=prec)  # (TB, Op)


def fuzzy_layer_forward(x, mu, sigma, rule_masks, rho, *, block_b=512,
                        bf16_defuzz=True):
    """Parameter gather / padding / flattening (glue) + Pallas kernel call.

    x:          (B, A) float32
    mu, sigma:  (M, A) float32 gaussian membership params
    rule_masks: (R, A) int32   rule index table (clustering rules -> identity)
    rho:        (O, R, A+1) float32 consequent params
    returns:    (B, O) float32
    """
    B, A = x.shape
    O, R, _ = rho.shape
    f32 = jnp.float32
    x = x.astype(f32)
    rho = rho.astype(f32)
    pdt = jnp.bfloat16 if bf16_defuzz else f32

    # Gather per-rule membership parameters: mu_r[r,a] = mu[rule_masks[r,a], a]
    col = jnp.arange(A)[None, :]
    mu_r = mu[rule_masks, col].astype(f32)                 # (R, A)
    sg_r = sigma[rule_masks, col].astype(f32)              # (R, A)
    invs2 = 1.0 / (sg_r * sg_r)                            # (R, A)

    # ---- padded sizes ----
    A1 = A + 1                                             # features + bias slot
    Kq = _round_up(2 * A + 1, 8)                           # [x*x | x | 1] lanes, 8-aligned
    Rp = _round_up(R, 128)                                 # rules on lanes
    C = O * A1
    Cp = _round_up(C, 128)                                 # (output, feature) groups
    Op = _round_up(O, 128)                                 # lane-dense output block

    # Balanced batch tiling; >=2 grid steps when B is big enough (v7x dual TC).
    n_tiles = max(1, _cdiv(B, block_b))
    if B >= 16 and n_tiles == 1:
        n_tiles = 2
    TB = _round_up(_cdiv(B, n_tiles), 8)
    Bp = TB * _cdiv(B, TB)

    # ---- streamed augmented input z = [x*x | x | 1 | 0-pad] ----
    z = jnp.zeros((Bp, Kq), f32)
    z = z.at[:B, :A].set(x * x)
    z = z.at[:B, A:2 * A].set(x)
    z = z.at[:, 2 * A].set(1.0)

    # ---- fused quadratic-form weights (already scaled by -0.5) ----
    Q = jnp.zeros((Kq, Rp), f32)
    Q = Q.at[:A, :R].set((-0.5 * invs2).T)
    Q = Q.at[A:2 * A, :R].set((mu_r * invs2).T)
    Q = Q.at[2 * A, :R].set(-0.5 * jnp.sum(mu_r * mu_r * invs2, axis=1))
    Q = Q.at[2 * A, R:].set(-1e30)                         # padded rules never fire

    # ---- consequent weights: W[r, o*A1+a] = rho[o, r, a] (bias at a == A) ----
    w_roa = jnp.transpose(rho, (1, 0, 2)).reshape(R, C)    # (R, O*(A+1))
    W = jnp.zeros((Rp, Cp), f32).at[:R, :C].set(w_roa).astype(pdt)

    # ---- 0/1 replication matrix (x + bias-1 into each output group) and scatter ----
    o_idx = jnp.repeat(jnp.arange(O), A1)                  # (C,)
    a_idx = jnp.tile(jnp.arange(A1), O)                    # (C,)
    row_idx = jnp.where(a_idx < A, A + a_idx, 2 * A)       # z-row feeding each column
    col_idx = o_idx * A1 + a_idx
    RepX = jnp.zeros((Kq, Cp), f32).at[row_idx, col_idx].set(1.0).astype(pdt)
    Sel = jnp.zeros((Cp, Op), f32).at[col_idx, o_idx].set(1.0).astype(pdt)

    # ---- VMEM budget (resident params double-buffered by BlockSpec) ----
    p_bytes = 2 if bf16_defuzz else 4
    resident = Kq * Rp * 4 + (Rp * Cp + Kq * Cp + Cp * Op) * p_bytes
    streamed = (TB * Kq + TB * Op) * 4
    interm = TB * (3 * Rp + 3 * Cp) * 4
    needed = 2 * (resident + streamed) + interm
    vmem_limit = int(min(128 << 20, max(32 << 20, 2 * needed)))

    kernel = functools.partial(fuzzy_forward_kernel, bf16_defuzz=bf16_defuzz)

    out_pad = pl.pallas_call(
        kernel,
        out_shape=jax.ShapeDtypeStruct((Bp, Op), f32),
        grid=(Bp // TB,),
        in_specs=[
            pl.BlockSpec((TB, Kq), lambda i: (i, 0)),      # z: batch-tiled, pipelined
            pl.BlockSpec((Kq, Rp), lambda i: (0, 0)),      # Q: resident
            pl.BlockSpec((Rp, Cp), lambda i: (0, 0)),      # W: resident
            pl.BlockSpec((Kq, Cp), lambda i: (0, 0)),      # RepX: resident
            pl.BlockSpec((Cp, Op), lambda i: (0, 0)),      # Sel: resident
        ],
        out_specs=pl.BlockSpec((TB, Op), lambda i: (i, 0)),
        compiler_params=pltpu.CompilerParams(
            dimension_semantics=("parallel",),
            vmem_limit_bytes=vmem_limit),
    )(z, Q, W, RepX, Sel)

    return out_pad[:B, :O]                                 # (B, O)


def ref_forward(x, mu, sigma, rule_masks, rho):
    """Pure-JAX reference replicating the PyTorch forward (for verification)."""
    memb = jnp.exp(-0.5 * ((x[:, None, :] - mu[None]) / sigma[None]) ** 2)      # (B,M,A)
    idx = jnp.broadcast_to(rule_masks[None], (x.shape[0],) + rule_masks.shape)   # (B,R,A)
    ante = jnp.take_along_axis(memb, idx, axis=1)                                # (B,R,A)
    firings = jnp.prod(ante, axis=2)                                             # (B,R)
    norm = firings / (jnp.sum(firings, axis=1, keepdims=True) + 1e-20)           # (B,R)
    conseqs = jnp.einsum("ba,ora->bor", x, rho[:, :, :-1],
                         precision=lax.Precision.HIGHEST) + rho[None, :, :, -1]
    return jnp.sum(conseqs * norm[:, None, :], axis=2)                           # (B,O)


if __name__ == "__main__":
    # Small, forward-consistent sizes
    B = 8            # batch
    A = 8            # n_inputs
    M = 5            # n_memberships
    O = 3            # n_outputs
    R = M            # n_rules (clustering=True, n_random_rules=0)

    key = jax.random.PRNGKey(0)
    k_mu, k_sig, k_rho, k_x = jax.random.split(key, 4)

    # Deterministic parameter init mirroring the module's __init__ shapes
    # (torch.rand -> U[0,1); sigma kept away from 0 for a well-conditioned test).
    mu = jax.random.uniform(k_mu, (M, A), dtype=jnp.float32)
    sigma = jax.random.uniform(k_sig, (M, A), dtype=jnp.float32) + 0.5
    rho = jax.random.uniform(k_rho, (O, R, A + 1), dtype=jnp.float32)

    # clustering=True rule masks: rule r uses membership r for every input
    rule_masks = jnp.tile(jnp.arange(R, dtype=jnp.int32)[:, None], (1, A))  # (R, A)

    x = jax.random.normal(k_x, (B, A), dtype=jnp.float32)

    ref = ref_forward(x, mu, sigma, rule_masks, rho)

    # Tight check: f32 / HIGHEST mode.
    out_f32 = jax.block_until_ready(
        fuzzy_layer_forward(x, mu, sigma, rule_masks, rho, bf16_defuzz=False))
    assert out_f32.shape == (B, O), out_f32.shape
    assert jnp.allclose(out_f32, ref, rtol=1e-4, atol=1e-5), (out_f32, ref)

    # Fast path: bf16 defuzzify (single-pass MXU); membership matmul stays f32.
    out_bf16 = jax.block_until_ready(
        fuzzy_layer_forward(x, mu, sigma, rule_masks, rho, bf16_defuzz=True))
    assert out_bf16.shape == (B, O), out_bf16.shape
    assert jnp.allclose(out_bf16, ref, rtol=5e-2, atol=5e-2), (out_bf16, ref)

    print("KERNEL_OK")
</pallas_src>

<mosaic_0001>
module attributes {stable_mosaic.version = 11 : i64} {
  func.func @fuzzy_forward_kernel(%arg0: i32, %arg1: memref<8x24xf32, #tpu.memory_space<vmem>>, %arg2: memref<24x128xf32, #tpu.memory_space<vmem>>, %arg3: memref<128x128xf32, #tpu.memory_space<vmem>>, %arg4: memref<24x128xf32, #tpu.memory_space<vmem>>, %arg5: memref<128x128xf32, #tpu.memory_space<vmem>>, %arg6: memref<8x128xf32, #tpu.memory_space<vmem>>) attributes {dimension_semantics = [#tpu.dimension_semantics<parallel>], iteration_bounds = array<i64: 1>, scalar_prefetch = 0 : i64, scratch_operands = 0 : i64, tpu.core_type = #tpu.core_type<tc>, window_params = [{transform_indices = @transform_0, window_bounds = array<i64: 8, 24>}, {pipeline_mode = #tpu.pipeline_mode<synchronous>, transform_indices = @transform_1, window_bounds = array<i64: 24, 128>}, {pipeline_mode = #tpu.pipeline_mode<synchronous>, transform_indices = @transform_2, window_bounds = array<i64: 128, 128>}, {pipeline_mode = #tpu.pipeline_mode<synchronous>, transform_indices = @transform_3, window_bounds = array<i64: 24, 128>}, {pipeline_mode = #tpu.pipeline_mode<synchronous>, transform_indices = @transform_4, window_bounds = array<i64: 128, 128>}, {transform_indices = @transform_5, window_bounds = array<i64: 8, 128>}]} {
    %c0 = arith.constant 0 : index
    %c0_0 = arith.constant 0 : index
    %0 = vector.load %arg1[%c0, %c0_0] : memref<8x24xf32, #tpu.memory_space<vmem>>, vector<8x24xf32>
    %c0_1 = arith.constant 0 : index
    %c0_2 = arith.constant 0 : index
    %1 = vector.load %arg2[%c0_1, %c0_2] : memref<24x128xf32, #tpu.memory_space<vmem>>, vector<24x128xf32>
    %cst = arith.constant dense<0.000000e+00> : vector<8x128xf32>
    %2 = tpu.matmul %0, %1, %cst {dimension_numbers = #tpu.dot_dimension_numbers<[1], [0], [0], [1], [0, 0, 1, 1], [], []>, precision = #tpu.contract_precision<fp32>} : vector<8x24xf32>, vector<24x128xf32>, vector<8x128xf32> -> vector<8x128xf32>
    %3 = math.exp %2 : vector<8x128xf32>
    %cst_3 = arith.constant dense<0.000000e+00> : vector<8xf32>
    %4 = vector.multi_reduction <add>, %3, %cst_3 [1] : vector<8x128xf32> to vector<8xf32>
    %5 = vector.shape_cast %4 : vector<8xf32> to vector<8x1xf32>
    %cst_4 = arith.constant 9.99999968E-21 : f32
    %6 = vector.broadcast %cst_4 : f32 to vector<8x1xf32>
    %7 = arith.addf %5, %6 : vector<8x1xf32>
    %8 = tpu.reciprocal %7 : vector<8x1xf32> -> vector<8x1xf32>
    %9 = vector.broadcast %8 : vector<8x1xf32> to vector<8x128xf32>
    %10 = arith.mulf %3, %9 : vector<8x128xf32>
    %c0_5 = arith.constant 0 : index
    %c0_6 = arith.constant 0 : index
    %11 = vector.load %arg3[%c0_5, %c0_6] : memref<128x128xf32, #tpu.memory_space<vmem>>, vector<128x128xf32>
    %cst_7 = arith.constant dense<0.000000e+00> : vector<8x128xf32>
    %12 = tpu.matmul %10, %11, %cst_7 {dimension_numbers = #tpu.dot_dimension_numbers<[1], [0], [0], [1], [0, 0, 1, 1], [], []>, precision = #tpu.contract_precision<fp32>} : vector<8x128xf32>, vector<128x128xf32>, vector<8x128xf32> -> vector<8x128xf32>
    %c0_8 = arith.constant 0 : index
    %c0_9 = arith.constant 0 : index
    %13 = vector.load %arg4[%c0_8, %c0_9] : memref<24x128xf32, #tpu.memory_space<vmem>>, vector<24x128xf32>
    %cst_10 = arith.constant dense<0.000000e+00> : vector<8x128xf32>
    %14 = tpu.matmul %0, %13, %cst_10 {dimension_numbers = #tpu.dot_dimension_numbers<[1], [0], [0], [1], [0, 0, 1, 1], [], []>, precision = #tpu.contract_precision<fp32>} : vector<8x24xf32>, vector<24x128xf32>, vector<8x128xf32> -> vector<8x128xf32>
    %15 = arith.mulf %12, %14 : vector<8x128xf32>
    %c0_11 = arith.constant 0 : index
    %c0_12 = arith.constant 0 : index
    %16 = vector.load %arg5[%c0_11, %c0_12] : memref<128x128xf32, #tpu.memory_space<vmem>>, vector<128x128xf32>
    %cst_13 = arith.constant dense<0.000000e+00> : vector<8x128xf32>
    %17 = tpu.matmul %15, %16, %cst_13 {dimension_numbers = #tpu.dot_dimension_numbers<[1], [0], [0], [1], [0, 0, 1, 1], [], []>, precision = #tpu.contract_precision<fp32>} : vector<8x128xf32>, vector<128x128xf32>, vector<8x128xf32> -> vector<8x128xf32>
    %c0_14 = arith.constant 0 : index
    %c0_15 = arith.constant 0 : index
    %18 = vector.load %arg6[%c0_14, %c0_15] : memref<8x128xf32, #tpu.memory_space<vmem>>, vector<8x128xf32>
    tpu.vector_store %arg6[%c0_14, %c0_15], %17 {strides = array<i32>} : memref<8x128xf32, #tpu.memory_space<vmem>>, vector<8x128xf32>,
    return
  }
  func.func @transform_0(%arg0: i32) -> (i32, i32) {
    %c0_i32 = arith.constant 0 : i32
    %c0_i32_0 = arith.constant 0 : i32
    return %arg0, %c0_i32 : i32, i32
  }
  func.func @transform_1(%arg0: i32) -> (i32, i32) {
    %c0_i32 = arith.constant 0 : i32
    %c0_i32_0 = arith.constant 0 : i32
    %c0_i32_1 = arith.constant 0 : i32
    return %c0_i32, %c0_i32_0 : i32, i32
  }
  func.func @transform_2(%arg0: i32) -> (i32, i32) {
    %c0_i32 = arith.constant 0 : i32
    %c0_i32_0 = arith.constant 0 : i32
    %c0_i32_1 = arith.constant 0 : i32
    return %c0_i32, %c0_i32_0 : i32, i32
  }
  func.func @transform_3(%arg0: i32) -> (i32, i32) {
    %c0_i32 = arith.constant 0 : i32
    %c0_i32_0 = arith.constant 0 : i32
    %c0_i32_1 = arith.constant 0 : i32
    return %c0_i32, %c0_i32_0 : i32, i32
  }
  func.func @transform_4(%arg0: i32) -> (i32, i32) {
    %c0_i32 = arith.constant 0 : i32
    %c0_i32_0 = arith.constant 0 : i32
    %c0_i32_1 = arith.constant 0 : i32
    return %c0_i32, %c0_i32_0 : i32, i32
  }
  func.func @transform_5(%arg0: i32) -> (i32, i32) {
    %c0_i32 = arith.constant 0 : i32
    %c0_i32_0 = arith.constant 0 : i32
    return %arg0, %c0_i32 : i32, i32
  }
}

</mosaic_0001>

<bundles_post_ra>
// kernel: tpu_custom_call.1
= control target key start
LH: loop header
LB: loop body
LE: loop exit
PB: predicated region body
PF: predicated region fallthrough
CT: control target
= control target key end

     0   :  { %10 = vsyncpa [#allocation3], 0  ;;  %s4469_s0 = inlined_call_operand.hbm [shape: f32[8,24], index: 0, kind: input, shape index: {}]   ;;  %s4470_s1 = inlined_call_operand.hbm [shape: f32[24,128], index: 1, kind: input, shape index: {}]   ;;  %s4471_s2 = inlined_call_operand.hbm [shape: f32[128,128], index: 2, kind: input, shape index: {}]   ;;  %s4472_s3 = inlined_call_operand.hbm [shape: f32[24,128], index: 3, kind: input, shape index: {}]   ;;  %s4473_s4 = inlined_call_operand.hbm [shape: f32[128,128], index: 4, kind: input, shape index: {}]   ;;  %s4474_s5 = inlined_call_operand.hbm [shape: f32[8,128], index: 5, kind: output, shape index: {}]  }
   0x1   :  { %11 = vsyncpa [#allocation6], 0 }
   0x2   :  { %12 = vsyncpa [#allocation9], 0 }
   0x3   :  { %13 = vsyncpa [#allocation4], 0  ;;  %s3679_s18 = smov [#allocation5]   ;;  %s3539_s22 = scalar_lea.hbm %s4470_s1, 384 }
   0x4   :  { %s29_s19 = sshll.u32 %s3679_s18, 4  ;;  %p3540_p0 = scmp.ne.s32.totalorder %s4470_s1, %s3539_s22  ;;  %s30_s19 = int_to_ptr.vmem [resolvable:$true] %s29_s19 }
   0x5   :  { %p3543_p1 = scmp.lt.u32.totalorder %s3539_s22, %s4470_s1 }
   0x7   :  { %p3545_p2 = pnand %p3543_p1, %p3540_p0 }
   0x9   :  { %3548 = shalt.err (!%p3545_p2)
}
   0xa   :  { %s3549_s27 = scalar_lea.vmem %s30_s19, 384  ;;  %p3554_p4 = scmp.lt.s32.totalorder %s30_s19, %s30_s19 }
   0xb   :  { %p3550_p3 = scmp.ne.s32.totalorder %s30_s19, %s3549_s27  ;;  %p3555_p5 = scmp.lt.s32.totalorder %s3549_s27, %s3549_s27 }
   0xd   :  { %p3556_p6 = por %p3555_p5, %p3554_p4 }
   0xf   :  { %p3557_p7 = pnand %p3556_p6, %p3550_p3 }
  0x11   :  { %3560 = shalt.err (!%p3557_p7)
}
  0x12   :  { %s3680_s28 = smov 128   ;;  %s3681_s29 = smov 8  }
  0x13   :  { %35 = dma.hbm_to_vmem [thread:$0]  %s4470_s1, 384, %s30_s19, [#allocation6], %s3680_s28, %s3680_s28, %s3681_s29  }
  0x14   :  { %s3682_s7 = smov [#allocation8]   ;;  %s3683_s9 = smov [#allocation2]  }
  0x15   :  { %s53_s8 = sshll.u32 %s3682_s7, 4  ;;  %s20_s10 = sshll.u32 %s3683_s9, 4  ;;  %s54_s8 = int_to_ptr.vmem [resolvable:$true] %s53_s8  ;;  %s21_s10 = int_to_ptr.vmem [resolvable:$true] %s20_s10 }
  0x16   :  { %s3561_s13 = scalar_lea.hbm %s4472_s3, 384 }
  0x17   :  { %p3562_p8 = scmp.ne.s32.totalorder %s4472_s3, %s3561_s13  ;;  %p3565_p9 = scmp.lt.u32.totalorder %s3561_s13, %s4472_s3 }
  0x19   :  { %p3567_p10 = pnand %p3565_p9, %p3562_p8 }
  0x1b   :  { %3570 = shalt.err (!%p3567_p10)
}
  0x1c   :  { %s3571_s1 = scalar_lea.vmem %s54_s8, 384  ;;  %p3576_p12 = scmp.lt.s32.totalorder %s54_s8, %s54_s8 }
  0x1d   :  { %p3572_p11 = scmp.ne.s32.totalorder %s54_s8, %s3571_s1  ;;  %p3577_p13 = scmp.lt.s32.totalorder %s3571_s1, %s3571_s1 }
  0x1f   :  { %p3578_p0 = por %p3577_p13, %p3576_p12 }
  0x21   :  { %p3579_p1 = pnand %p3578_p0, %p3572_p11 }
  0x23   :  { %3582 = shalt.err (!%p3579_p1)
}
  0x24   :  { %59 = dma.hbm_to_vmem [thread:$0]  %s4472_s3, 384, %s54_s8, [#allocation9], %s3680_s28, %s3680_s28, %s3681_s29  }
  0x25   :  { %s3583_s22 = scalar_lea.hbm %s4469_s0, 128 }
  0x26   :  { %p3584_p2 = scmp.ne.s32.totalorder %s4469_s0, %s3583_s22  ;;  %p3587_p3 = scmp.lt.u32.totalorder %s3583_s22, %s4469_s0 }
  0x28   :  { %p3589_p4 = pnand %p3587_p3, %p3584_p2 }
  0x2a   :  { %3592 = shalt.err (!%p3589_p4)
}
  0x2b   :  { %s3593_s27 = scalar_lea.vmem %s21_s10, 128  ;;  %p3598_p6 = scmp.lt.s32.totalorder %s21_s10, %s21_s10 }
  0x2c   :  { %p3594_p5 = scmp.ne.s32.totalorder %s21_s10, %s3593_s27  ;;  %p3599_p7 = scmp.lt.s32.totalorder %s3593_s27, %s3593_s27 }
  0x2e   :  { %p3600_p8 = por %p3599_p7, %p3598_p6 }
  0x30   :  { %p3601_p9 = pnand %p3600_p8, %p3594_p5 }
  0x32   :  { %3604 = shalt.err (!%p3601_p9)
}
  0x33   :  { %23 = dma.hbm_to_vmem [thread:$0]  %s4469_s0, 128, %s21_s10, [#allocation3]  }
  0x34   :  { %s3684_s6 = smov [#allocation7]   ;;  %s3685_s8 = smov [#allocation10]  }
  0x35   :  { %s41_s7 = sshll.u32 %s3684_s6, 4  ;;  %s65_s9 = sshll.u32 %s3685_s8, 4  ;;  %s42_s7 = int_to_ptr.vmem [resolvable:$true] %s41_s7  ;;  %s66_s9 = int_to_ptr.vmem [resolvable:$true] %s65_s9 }
  0x36   :  { %s3605_s13 = scalar_lea.hbm %s4471_s2, 2048 }
  0x37   :  { %p3606_p10 = scmp.ne.s32.totalorder %s4471_s2, %s3605_s13  ;;  %p3609_p11 = scmp.lt.u32.totalorder %s3605_s13, %s4471_s2 }
  0x39   :  { %p3611_p12 = pnand %p3609_p11, %p3606_p10 }
  0x3b   :  { %3614 = shalt.err (!%p3611_p12)
}
  0x3c   :  { %s3615_s0 = scalar_lea.vmem %s42_s7, 2048  ;;  %p3620_p0 = scmp.lt.s32.totalorder %s42_s7, %s42_s7 }
  0x3d   :  { %p3616_p13 = scmp.ne.s32.totalorder %s42_s7, %s3615_s0  ;;  %p3621_p1 = scmp.lt.s32.totalorder %s3615_s0, %s3615_s0 }
  0x3f   :  { %p3622_p2 = por %p3621_p1, %p3620_p0 }
  0x41   :  { %p3623_p3 = pnand %p3622_p2, %p3616_p13 }
  0x43   :  { %3626 = shalt.err (!%p3623_p3)
}
  0x44   :  { %47 = dma.hbm_to_vmem [thread:$0]  %s4471_s2, 2048, %s42_s7, [#allocation6], %s3680_s28, %s3680_s28, %s3681_s29  }
  0x45   :  { %s3627_s20 = scalar_lea.hbm %s4473_s4, 2048 }
  0x46   :  { %p3628_p4 = scmp.ne.s32.totalorder %s4473_s4, %s3627_s20  ;;  %p3631_p5 = scmp.lt.u32.totalorder %s3627_s20, %s4473_s4 }
  0x48   :  { %p3633_p6 = pnand %p3631_p5, %p3628_p4 }
  0x4a   :  { %3636 = shalt.err (!%p3633_p6)
}
  0x4b   :  { %s3637_s25 = scalar_lea.vmem %s66_s9, 2048  ;;  %p3642_p8 = scmp.lt.s32.totalorder %s66_s9, %s66_s9 }
  0x4c   :  { %p3638_p7 = scmp.ne.s32.totalorder %s66_s9, %s3637_s25  ;;  %p3643_p9 = scmp.lt.s32.totalorder %s3637_s25, %s3637_s25 }
  0x4e   :  { %p3644_p10 = por %p3643_p9, %p3642_p8 }
  0x50   :  { %p3645_p11 = pnand %p3644_p10, %p3638_p7 }
  0x52   :  { %3648 = shalt.err (!%p3645_p11)
}
  0x53   :  { %71 = dma.hbm_to_vmem [thread:$0]  %s4473_s4, 2048, %s66_s9, [#allocation9], %s3680_s28, %s3680_s28, %s3681_s29  }
  0x54   :  { %3671 = dma.done.wait [#allocation3], 128  }
  0x55   :  { %3672 = vsyncadd [#allocation3], 4294967168 }
  0x56   :  { %3673 = dma.done.wait [#allocation6], 2432  }
  0x57   :  { %3674 = vsyncadd [#allocation6], 4294964864 }
  0x58   :  { %3675 = dma.done.wait [#allocation9], 2432  }
  0x59   :  { %3676 = vsyncadd [#allocation9], 4294964864  ;;  %v4501_v0 = vmov 0.0|0.0   ;;  %vm3687_vm0 = vmmov 0   ;;  %v4497_v1 = vmov 0.0   ;;  %vm91_vm1 = vcmask 195584  }
  0x5a   :  { %3165 = vmatprep.subr.bf16.mxu0 %v4501_v0  ;;  %2649 = vmatprep.mubr.msk.f32.mxu0 %vm3687_vm0, %v4497_v1  ;;  %v88_v2 = vld [vmem:[#allocation5] sm:$0xff]  ;;  %v89_v3 = vld [vmem:[#allocation5 + $0x8] sm:$0xff]  ;;  %v90_v4 = vld [vmem:[#allocation5 + $0x10] sm:$0xff]  ;;  %s3689_s4 = smov [#allocation11]  }
  0x5b   :  { %3162 = vmatprep.subr.bf16.mxu1 %v4501_v0  ;;  %2640 = vmatprep.mubr.msk.f32.mxu1 %vm3687_vm0, %v4497_v1  ;;  %v96_v5 = vand.u32 4294901760, %v88_v2  ;;  %v99_v6 = vand.u32 4294901760, %v89_v3  ;;  %v102_v7 = vand.u32 4294901760, %v90_v4  ;;  %v87_v8 = vld [vmem:[#allocation2] sm:$0xff]  ;;  %v575_v32 = vld [vmem:[#allocation7 + $0x8] sm:$0xff]  ;;  %v576_v33 = vld [vmem:[#allocation7 + $0x10] sm:$0xff] }
  0x5c   :  { %v93_v9 = vsel %vm91_vm1, %v87_v8, 0  ;;  %v574_v31 = vld [vmem:[#allocation7] sm:$0xff]  ;;  %v594_v35 = vand.u32 4294901760, %v575_v32  ;;  %v577_v36 = vld [vmem:[#allocation7 + $0x18] sm:$0xff]  ;;  %v597_v37 = vand.u32 4294901760, %v576_v33  ;;  %v579_v53 = vld [vmem:[#allocation7 + $0x28] sm:$0xff] }
  0x5d   :  { %v175_v10 = vsub.f32 %v88_v2, %v96_v5  ;;  %v182_v11 = vsub.f32 %v89_v3, %v99_v6  ;;  %v189_v12 = vsub.f32 %v90_v4, %v102_v7  ;;  %v3798_v13 = vand.u32 4294901760, %v93_v9  ;;  %v578_v52 = vld [vmem:[#allocation7 + $0x20] sm:$0xff]  ;;  %v580_v57 = vld [vmem:[#allocation7 + $0x30] sm:$0xff]  ;;  %v581_v58 = vld [vmem:[#allocation7 + $0x38] sm:$0xff]  ;;  %s2371_s28 = sshll.u32 %s3689_s4, 4  ;;  %s2372_s28 = int_to_ptr.vmem [resolvable:$true] %s2371_s28 }
  0x5e   :  { %v3163_v14 = vpack.c.bf16 %v99_v6, %v96_v5  ;;  %v591_v34 = vand.u32 4294901760, %v574_v31  ;;  %v600_v38 = vand.u32 4294901760, %v577_v36  ;;  %v3844_v41 = vsub.f32 %v575_v32, %v594_v35  ;;  %v582_v62 = vld [vmem:[#allocation7 + $0x40] sm:$0xff]  ;;  %v583_v63 = vld [vmem:[#allocation7 + $0x48] sm:$0xff]  ;;  %v584_v5 = vld [vmem:[#allocation7 + $0x50] sm:$0xff]  ;;  %s3649_s29 = scalar_lea.vmem %s2372_s28, 128  ;;  %p3654_p13 = scmp.lt.s32.totalorder %s2372_s28, %s2372_s28 }
  0x5f   :  { %v176_v15 = vand.u32 4294901760, %v175_v10  ;;  %v183_v16 = vand.u32 4294901760, %v182_v11  ;;  %v190_v17 = vand.u32 4294901760, %v189_v12  ;;  %v3801_v18 = vsub.f32 %v93_v9, %v3798_v13  ;;  %v585_v6 = vld [vmem:[#allocation7 + $0x58] sm:$0xff]  ;;  %p3650_p12 = scmp.ne.s32.totalorder %s2372_s28, %s3649_s29  ;;  %p3655_p0 = scmp.lt.s32.totalorder %s3649_s29, %s3649_s29 }
  0x60   :  { %3164 = vmatpush3.bf16.msra.mxu1 %v3163_v14  ;;  %v3169_v29 = vpack.c.bf16 %v182_v11, %v175_v10  ;;  %v3840_v39 = vpack.c.bf16 %v594_v35, %v591_v34  ;;  %v3842_v40 = vsub.f32 %v574_v31, %v591_v34  ;;  %v3846_v42 = vsub.f32 %v576_v33, %v597_v37 }
  0x61   :  { %v177_v19 = vsub.f32 %v175_v10, %v176_v15  ;;  %v184_v20 = vsub.f32 %v182_v11, %v183_v16  ;;  %2638 = vmatprep.subr.mxu1 %v4497_v1  ;;  %v3805_v21 = vand.u32 4294901760, %v3801_v18  ;;  %v191_v24 = vsub.f32 %v189_v12, %v190_v17  ;;  %v586_v10 = vld [vmem:[#allocation7 + $0x60] sm:$0xff]  ;;  %v587_v11 = vld [vmem:[#allocation7 + $0x68] sm:$0xff]  ;;  %p3656_p1 = por %p3655_p0, %p3654_p13 }
  0x62   :  { %v3175_v30 = vpack.c.bf16 %v183_v16, %v176_v15  ;;  %v3848_v43 = vsub.f32 %v577_v36, %v600_v38  ;;  %v3851_v44 = vpack.c.bf16 %v600_v38, %v597_v37  ;;  %v603_v54 = vand.u32 4294901760, %v578_v52 }
  0x63   :  { %v178_v22 = vand.u32 4294901760, %v177_v19  ;;  %v185_v23 = vand.u32 4294901760, %v184_v20  ;;  %v166_v25 = vsub.f32 %v3801_v18, %v3805_v21  ;;  %v192_v28 = vand.u32 4294901760, %v191_v24  ;;  %v588_v20 = vld [vmem:[#allocation7 + $0x70] sm:$0xff]  ;;  %p3657_p2 = pnand %p3656_p1, %p3650_p12 }
  0x64   :  { %2639 = vmatpush3.msra.mxu1 %v102_v7  ;;  %v606_v55 = vand.u32 4294901760, %v579_v53  ;;  %v609_v59 = vand.u32 4294901760, %v580_v57  ;;  %v612_v60 = vand.u32 4294901760, %v581_v58  ;;  %v615_v2 = vand.u32 4294901760, %v582_v62 }
  0x65   :  { %v3166_v26 = vpack.c.bf16 %v185_v23, %v178_v22  ;;  %3180 = vmatprep.subr.bf16.mxu1 %v4501_v0  ;;  %v3810_v27 = vand.u32 4294901760, %v166_v25  ;;  %v618_v3 = vand.u32 4294901760, %v583_v63  ;;  %v624_v8 = vand.u32 4294901760, %v585_v6  ;;  %v589_v22 = vld [vmem:[#allocation7 + $0x78] sm:$0xff] }
  0x66   :  { %v3859_v56 = vpack.c.bf16 %v606_v55, %v603_v54  ;;  %v3863_v61 = vpack.c.bf16 %v612_v60, %v609_v59  ;;  %v3875_v15 = vsub.f32 %v578_v52, %v603_v54  ;;  %v3877_v16 = vsub.f32 %v579_v53, %v606_v55 }
  0x67   :  { %3167 = vmatpush3.bf16.msra.mxu0 %v3166_v26  ;;  %2641 = vmatmul.mubr.f32.vlgmr.msra.gmra.mrb[0].mxu1 %v3810_v27  ;;  %v3867_v4 = vpack.c.bf16 %v618_v3, %v615_v2  ;;  %v3881_v19 = vsub.f32 %v581_v58, %v612_v60  ;;  %v3883_v23 = vsub.f32 %v582_v62, %v615_v2  ;;  %v633_v31 = vand.u32 4294901760, %v588_v20 }
  0x68   :  { %2647 = vmatprep.subr.mxu0 %v4497_v1  ;;  %2720 = vmatprep.mubr.msk.f32.mxu1 %vm3687_vm0, %v4497_v1  ;;  %v3885_v24 = vsub.f32 %v583_v63, %v618_v3  ;;  %v3889_v26 = vsub.f32 %v585_v6, %v624_v8  ;;  %v636_v32 = vand.u32 4294901760, %v589_v22  ;;  %v4490_v33 = vand.u32 4294901760, %v3842_v40 }
  0x69   :  { %3182 = vmatpush3.bf16.msra.mxu1 %v3840_v39  ;;  %v4489_v34 = vand.u32 4294901760, %v3844_v41  ;;  %v3900_v35 = vsub.f32 %v588_v20, %v633_v31  ;;  %v4485_v58 = vand.u32 4294901760, %v3877_v16 }
  0x6a   :  { %3183 = vmatprep.subr.bf16.mxu1 %v4501_v0  ;;  %v3903_v36 = vpack.c.bf16 %v636_v32, %v633_v31  ;;  %v3905_v37 = vsub.f32 %v589_v22, %v636_v32  ;;  %v685_v38 = vsub.f32 %v3842_v40, %v4490_v33 }
  0x6b   :  { %2648 = vmatpush3.msra.mxu0 %v192_v28  ;;  %v720_v62 = vsub.f32 %v3877_v16, %v4485_v58 }
  0x6c   :  { %2650 = vmatmul.mubr.f32.vlgmr.msra.gmra.mrb[0].mxu0 %v3798_v13  ;;  %3168 = vmatprep.subr.bf16.mxu0 %v4501_v0 }
  0x6d   :  { %3170 = vmatpush3.bf16.msra.mxu0 %v3169_v29  ;;  %2658 = vmatprep.mubr.msk.f32.mxu0 %vm3687_vm0, %v4497_v1  ;;  %v721_v2 = vand.u32 4294901760, %v720_v62 }
  0x6e   :  { %2656 = vmatprep.subr.mxu0 %v4497_v1  ;;  %3185 = vmatpush3.bf16.msra.mxu1 %v3851_v44 }
  0x6f   :  { %3186 = vmatprep.subr.bf16.mxu1 %v4501_v0 }
  0x71   :  { %2657 = vmatpush3.msra.mxu0 %v189_v12  ;;  %v627_v12 = vand.u32 4294901760, %v586_v10 }
  0x72   :  { %3171 = vmatprep.subr.bf16.mxu0 %v4501_v0  ;;  %3188 = vmatpush3.bf16.msra.mxu1 %v3859_v56 }
  0x73   :  { %3189 = vmatprep.subr.bf16.mxu1 %v4501_v0  ;;  %v3893_v29 = vsub.f32 %v586_v10, %v627_v12 }
  0x74   :  { %2659 = vmatmul.mubr.f32.vlgmr.msra.gmra.mrb[0].mxu0 %v3801_v18 }
  0x75   :  { %3173 = vmatpush3.bf16.msra.mxu0 %v3163_v14  ;;  %2667 = vmatprep.mubr.msk.f32.mxu0 %vm3687_vm0, %v4497_v1 }
  0x76   :  { %2665 = vmatprep.subr.mxu0 %v4497_v1  ;;  %3191 = vmatpush3.bf16.msra.mxu1 %v3863_v61 }
  0x77   :  { %3192 = vmatprep.subr.bf16.mxu1 %v4501_v0 }
  0x79   :  { %2666 = vmatpush3.msra.mxu0 %v102_v7 }
  0x7a   :  { %3174 = vmatprep.subr.bf16.mxu0 %v4501_v0  ;;  %3194 = vmatpush3.bf16.msra.mxu1 %v3867_v4 }
  0x7b   :  { %3195 = vmatprep.subr.bf16.mxu1 %v4501_v0 }
  0x7c   :  { %2668 = vmatmul.mubr.f32.vlgmr.msra.gmra.mrb[0].mxu0 %v3805_v21 }
  0x7d   :  { %3176 = vmatpush3.bf16.msra.mxu0 %v3175_v30  ;;  %2676 = vmatprep.mubr.msk.f32.mxu0 %vm3687_vm0, %v4497_v1 }
  0x7e   :  { %2674 = vmatprep.subr.mxu0 %v4497_v1 }
  0x81   :  { %2675 = vmatpush3.msra.mxu0 %v190_v17  ;;  %v3879_v17 = vsub.f32 %v580_v57, %v609_v59  ;;  %v4486_v57 = vand.u32 4294901760, %v3875_v15 }
  0x82   :  { %3177 = vmatprep.subr.bf16.mxu0 %v4501_v0 }
  0x83   :  { %v713_v60 = vsub.f32 %v3875_v15, %v4486_v57  ;;  %v4484_v3 = vand.u32 4294901760, %v3879_v17 }
  0x84   :  { %2677 = vmatmul.mubr.f32.vlgmr.msra.gmra.mrb[0].mxu0 %v3798_v13 }
  0x85   :  { %3179 = vmatpush3.bf16.msra.mxu0 %v3163_v14  ;;  %2685 = vmatprep.mubr.msk.f32.mxu0 %vm3687_vm0, %v4497_v1  ;;  %v630_v14 = vand.u32 4294901760, %v587_v11  ;;  %v714_v63 = vand.u32 4294901760, %v713_v60  ;;  %v4478_v60 = vand.u32 4294901760, %v3893_v29 }
  0x86   :  { %2683 = vmatprep.subr.mxu0 %v4497_v1 }
  0x87   :  { %v3891_v28 = vpack.c.bf16 %v630_v14, %v627_v12  ;;  %v3895_v30 = vsub.f32 %v587_v11, %v630_v14  ;;  %v3937_v6 = vpack.c.bf16 %v721_v2, %v714_v63  ;;  %v4482_v12 = vand.u32 4294901760, %v3883_v23 }
  0x88   :  { %v4481_v14 = vand.u32 4294901760, %v3885_v24  ;;  %v769_v2 = vsub.f32 %v3893_v29, %v4478_v60 }
  0x89   :  { %2684 = vmatpush3.msra.mxu0 %v102_v7  ;;  %v621_v7 = vand.u32 4294901760, %v584_v5  ;;  %v741_v22 = vsub.f32 %v3883_v23, %v4482_v12  ;;  %v4477_v62 = vand.u32 4294901760, %v3895_v30 }
  0x8a   :  { %3324 = vmatprep.subr.bf16.mxu0 %v4501_v0  ;;  %v748_v31 = vsub.f32 %v3885_v24, %v4481_v14 }
  0x8b   :  { %v3871_v9 = vpack.c.bf16 %v624_v8, %v621_v7  ;;  %v3887_v25 = vsub.f32 %v584_v5, %v621_v7  ;;  %v4483_v5 = vand.u32 4294901760, %v3881_v19  ;;  %v727_v7 = vsub.f32 %v3879_v17, %v4484_v3 }
  0x8c   :  { %2686 = vmatmul.mubr.f32.vlgmr.msra.gmra.mrb[0].mxu0 %v3798_v13  ;;  %v742_v32 = vand.u32 4294901760, %v741_v22  ;;  %v4475_v22 = vand.u32 4294901760, %v3905_v37 }
  0x8d   :  { %2904 = vmatprep.mubr.msk.f32.mxu0 %vm3687_vm0, %v4497_v1  ;;  %3197 = vmatpush3.bf16.msra.mxu1 %v3871_v9  ;;  %v734_v8 = vsub.f32 %v3881_v19, %v4483_v5  ;;  %v728_v10 = vand.u32 4294901760, %v727_v7  ;;  %v776_v7 = vsub.f32 %v3895_v30, %v4477_v62  ;;  %v1233_v5 = vld [vmem:[#allocation8 + $0x10] sm:$0xff] }
  0x8e   :  { %3198 = vmatprep.subr.bf16.mxu1 %v4501_v0  ;;  %v1241_v3 = vand.u32 4294901760, %v1233_v5 }
  0x8f   :  { %v735_v11 = vand.u32 4294901760, %v734_v8  ;;  %v770_v8 = vand.u32 4294901760, %v769_v2  ;;  %v3232_v2 = vpack.c.bf16 %v3848_v43, %v3846_v42 }
  0x91   :  { %3200 = vmatpush3.bf16.msra.mxu1 %v3891_v28  ;;  %v3947_v20 = vpack.c.bf16 %v735_v11, %v728_v10  ;;  %v777_v10 = vand.u32 4294901760, %v776_v7  ;;  %v4476_v11 = vand.u32 4294901760, %v3900_v35  ;;  %v3235_v7 = vpack.c.bf16 %v3877_v16, %v3875_v15 }
  0x92   :  { %3201 = vmatprep.subr.bf16.mxu1 %v4501_v0 }
  0x95   :  { %3203 = vmatpush3.bf16.msra.mxu1 %v3903_v36 }
  0x96   :  { %3204 = vmatprep.subr.bf16.mxu1 %v4501_v0 }
 0x13a   :  { %v169_v45 = vpop.f32.mrb[0].mxu1 }
 0x13b   :  { %v2642_v46 = vpop.f32.mrb[1].mxu1 }
 0x13c   :  { %v686_v46 = vand.u32 4294901760, %v685_v38  ;;  %v749_v38 = vand.u32 4294901760, %v748_v31  ;;  %v3977_v31 = vpack.c.bf16 %v777_v10, %v770_v8  ;;  %v3238_v8 = vpack.c.bf16 %v3881_v19, %v3879_v17 }
 0x13d   :  { %v3241_v10 = vpack.c.bf16 %v3885_v24, %v3883_v23 }
 0x15f   :  { %v563_v47 = vpop.f32.mrb[0].mxu0 }
 0x160   :  { %v3486_v48 = vadd.f32 %v563_v47, %v169_v45  ;;  %v2687_v49 = vpop.f32.mrb[1].mxu0  ;;  %v692_v45 = vsub.f32 %v3844_v41, %v4489_v34 }
 0x161   :  { %v4487_v49 = vand.u32 4294901760, %v3848_v43 }
 0x162   :  { %v567_v50 = vmul.f32 1.442695, %v3486_v48  ;;  %v693_v47 = vand.u32 4294901760, %v692_v45  ;;  %v4488_v48 = vand.u32 4294901760, %v3846_v42  ;;  %v4480_v45 = vand.u32 4294901760, %v3887_v25 }
 0x163   :  { %v706_v53 = vsub.f32 %v3848_v43, %v4487_v49  ;;  %v1328_v49 = vsub.f32 %v1233_v5, %v1241_v3 }
 0x164   :  { %3535 = vpow2.f32 %v567_v50  ;;  %v3917_v50 = vpack.c.bf16 %v693_v47, %v686_v46  ;;  %v699_v52 = vsub.f32 %v3846_v42, %v4488_v48  ;;  %v4479_v46 = vand.u32 4294901760, %v3889_v26 }
 0x165   :  { %v707_v55 = vand.u32 4294901760, %v706_v53  ;;  %v3957_v47 = vpack.c.bf16 %v749_v38, %v742_v32  ;;  %v783_v32 = vsub.f32 %v3900_v35, %v4476_v11  ;;  %v790_v38 = vsub.f32 %v3905_v37, %v4475_v22  ;;  %v1232_v22 = vld [vmem:[#allocation8 + $0x8] sm:$0xff] }
 0x166   :  { %v700_v54 = vand.u32 4294901760, %v699_v52  ;;  %v755_v52 = vsub.f32 %v3887_v25, %v4480_v45  ;;  %v762_v53 = vsub.f32 %v3889_v26, %v4479_v46  ;;  %v1238_v62 = vand.u32 4294901760, %v1232_v22 }
 0x168   :  { %v3927_v59 = vpack.c.bf16 %v707_v55, %v700_v54  ;;  %v756_v54 = vand.u32 4294901760, %v755_v52  ;;  %v763_v55 = vand.u32 4294901760, %v762_v53  ;;  %v784_v52 = vand.u32 4294901760, %v783_v32 }
 0x169   :  { %v791_v53 = vand.u32 4294901760, %v790_v38  ;;  %v3244_v32 = vpack.c.bf16 %v3889_v26, %v3887_v25  ;;  %v3247_v38 = vpack.c.bf16 %v3895_v30, %v3893_v29  ;;  %v1321_v45 = vsub.f32 %v1232_v22, %v1238_v62 }
 0x16a   :  { %v3967_v63 = vpack.c.bf16 %v763_v55, %v756_v54  ;;  %v3229_v55 = vpack.c.bf16 %v3844_v41, %v3842_v40 }
 0x16b   :  { %v3985_v54 = vpack.c.bf16 %v791_v53, %v784_v52  ;;  %v3250_v52 = vpack.c.bf16 %v3905_v37, %v3900_v35  ;;  %v1231_v53 = vld [vmem:[#allocation8] sm:$0xff]  ;;  %v1322_v12 = vand.u32 4294901760, %v1321_v45 }
 0x16c   :  { %v1235_v11 = vand.u32 4294901760, %v1231_v53 }
 0x16d   :  { %v1323_v57 = vsub.f32 %v1321_v45, %v1322_v12 }
 0x16e   :  { %v3856_v51 = vpop.eup %3535  ;;  %v3325_v60 = vpack.c.bf16 %v1238_v62, %v1235_v11  ;;  %v1314_v46 = vsub.f32 %v1231_v53, %v1235_v11  ;;  %v1329_v11 = vand.u32 4294901760, %v1328_v49 }
 0x16f   :  { %569 = vadd.xlane.f32.xlu0 %v3856_v51  ;;  %v1324_v34 = vand.u32 4294901760, %v1323_v57 }
 0x170   :  { %3326 = vmatpush3.bf16.msra.mxu0 %v3325_v60  ;;  %v1315_v14 = vand.u32 4294901760, %v1314_v46  ;;  %v1330_v62 = vsub.f32 %v1328_v49, %v1329_v11  ;;  %v3331_v57 = vpack.c.bf16 %v1321_v45, %v1314_v46  ;;  %v1712_v45 = vld [vmem:[#allocation10 + $0x28] sm:$0xff] }
 0x171   :  { %2902 = vmatprep.subr.mxu0 %v4497_v1 }
 0x172   :  { %v1316_v58 = vsub.f32 %v1314_v46, %v1315_v14  ;;  %v1331_v22 = vand.u32 4294901760, %v1330_v62 }
 0x174   :  { %2903 = vmatpush3.msra.mxu0 %v1241_v3  ;;  %v1317_v48 = vand.u32 4294901760, %v1316_v58 }
 0x175   :  { %2905 = vmatmul.mubr.f32.vlgmr.msra.gmra.mrb[2].mxu0 %v3810_v27  ;;  %3327 = vmatprep.subr.bf16.mxu0 %v4501_v0 }
 0x176   :  { %v3328_v33 = vpack.c.bf16 %v1324_v34, %v1317_v48  ;;  %2913 = vmatprep.mubr.msk.f32.mxu0 %vm3687_vm0, %v4497_v1  ;;  %v3337_v34 = vpack.c.bf16 %v1322_v12, %v1315_v14  ;;  %v1710_v12 = vld [vmem:[#allocation10 + $0x18] sm:$0xff] }
 0x177   :  { %v1733_v46 = vand.u32 4294901760, %v1710_v12 }
 0x178   :  { %3329 = vmatpush3.bf16.msra.mxu0 %v3328_v33 }
 0x179   :  { %2911 = vmatprep.subr.mxu0 %v4497_v1 }
 0x17c   :  { %2912 = vmatpush3.msra.mxu0 %v1331_v22 }
 0x17d   :  { %2914 = vmatmul.mubr.f32.vlgmr.msra.gmra.mrb[2].mxu0 %v3798_v13  ;;  %3330 = vmatprep.subr.bf16.mxu0 %v4501_v0 }
 0x17e   :  { %2922 = vmatprep.mubr.msk.f32.mxu0 %vm3687_vm0, %v4497_v1  ;;  %3332 = vmatpush3.bf16.msra.mxu0 %v3331_v57 }
 0x17f   :  { %2920 = vmatprep.subr.mxu0 %v4497_v1 }
 0x182   :  { %2921 = vmatpush3.msra.mxu0 %v1328_v49 }
 0x183   :  { %3333 = vmatprep.subr.bf16.mxu0 %v4501_v0 }
 0x185   :  { %2923 = vmatmul.mubr.f32.vlgmr.msra.gmra.mrb[2].mxu0 %v3801_v18 }
 0x186   :  { %3335 = vmatpush3.bf16.msra.mxu0 %v3325_v60  ;;  %2931 = vmatprep.mubr.msk.f32.mxu0 %vm3687_vm0, %v4497_v1 }
 0x187   :  { %2929 = vmatprep.subr.mxu0 %v4497_v1 }
 0x18a   :  { %2930 = vmatpush3.msra.mxu0 %v1241_v3 }
 0x18b   :  { %3336 = vmatprep.subr.bf16.mxu0 %v4501_v0 }
 0x18d   :  { %2932 = vmatmul.mubr.f32.vlgmr.msra.gmra.mrb[2].mxu0 %v3805_v21 }
 0x18e   :  { %2940 = vmatprep.mubr.msk.f32.mxu0 %vm3687_vm0, %v4497_v1  ;;  %3338 = vmatpush3.bf16.msra.mxu0 %v3337_v34 }
 0x18f   :  { %2938 = vmatprep.subr.mxu0 %v4497_v1 }
 0x192   :  { %2939 = vmatpush3.msra.mxu0 %v1329_v11 }
 0x193   :  { %3339 = vmatprep.subr.bf16.mxu0 %v4501_v0 }
 0x195   :  { %2941 = vmatmul.mubr.f32.vlgmr.msra.gmra.mrb[2].mxu0 %v3798_v13 }
 0x196   :  { %3341 = vmatpush3.bf16.msra.mxu0 %v3325_v60  ;;  %2949 = vmatprep.mubr.msk.f32.mxu0 %vm3687_vm0, %v4497_v1  ;;  %v1739_v60 = vand.u32 4294901760, %v1712_v45 }
 0x197   :  { %2947 = vmatprep.subr.mxu0 %v4497_v1 }
 0x19a   :  { %2948 = vmatpush3.msra.mxu0 %v1241_v3 }
 0x19b   :  { %3366 = vmatprep.subr.bf16.mxu0 %v4501_v0 }
 0x19d   :  { %2950 = vmatmul.mubr.f32.vlgmr.msra.gmra.mrb[2].mxu0 %v3798_v13  ;;  %v1707_v13 = vld [vmem:[#allocation10] sm:$0xff] }
 0x19e   :  { %3019 = vmatprep.mubr.msk.f32.mxu0 %vm3687_vm0, %v4497_v1  ;;  %v1724_v3 = vand.u32 4294901760, %v1707_v13 }
 0x1fc   :  { %v570_v27 = vpop.xlane.xlu0 %569 }
 0x1fd   :  { %v571_v33 = vadd.f32 1e-20, %v570_v27 }
 0x1ff   :  { %3537 = vrcp.f32 %v571_v33 }
 0x209   :  { %v3538_v18 = vpop.eup %3537 }
 0x20a   :  { %v573_v21 = vmul.f32 %v3538_v18, %v3856_v51 }
 0x20c   :  { %v4031_v48 = vand.u32 4294901760, %v573_v21 }
 0x20e   :  { %v4035_v49 = vsub.f32 %v573_v21, %v4031_v48 }
 0x210   :  { %v4500_v58 = vand.u32 4294901760, %v4035_v49 }
 0x212   :  { %v674_v5 = vsub.f32 %v4035_v49, %v4500_v58  ;;  %v4169_v58 = vld [vmem:[#allocation10 + $0x68] sm:$0xff] }
 0x214   :  { %v675_v51 = vand.u32 4294901760, %v674_v5 }
 0x216   :  { %2721 = vmatmul.mubr.f32.vlgmr.msra.gmra.mrb[2].mxu1 %v675_v51 }
 0x217   :  { %3206 = vmatpush3.bf16.msra.mxu1 %v3917_v50  ;;  %2755 = vmatprep.mubr.msk.f32.mxu1 %vm3687_vm0, %v4497_v1  ;;  %v1708_v50 = vld [vmem:[#allocation10 + $0x8] sm:$0xff] }
 0x218   :  { %3207 = vmatprep.subr.bf16.mxu1 %v4501_v0 }
 0x21b   :  { %3209 = vmatpush3.bf16.msra.mxu1 %v3927_v59  ;;  %v1709_v59 = vld [vmem:[#allocation10 + $0x10] sm:$0xff] }
 0x21c   :  { %3210 = vmatprep.subr.bf16.mxu1 %v4501_v0  ;;  %v1730_v14 = vand.u32 4294901760, %v1709_v59 }
 0x21f   :  { %3212 = vmatpush3.bf16.msra.mxu1 %v3937_v6  ;;  %v1727_v6 = vand.u32 4294901760, %v1708_v50 }
 0x220   :  { %3213 = vmatprep.subr.bf16.mxu1 %v4501_v0 }
 0x223   :  { %3215 = vmatpush3.bf16.msra.mxu1 %v3947_v20  ;;  %v1711_v20 = vld [vmem:[#allocation10 + $0x20] sm:$0xff] }
 0x224   :  { %3216 = vmatprep.subr.bf16.mxu1 %v4501_v0 }
 0x227   :  { %3218 = vmatpush3.bf16.msra.mxu1 %v3957_v47  ;;  %v1736_v47 = vand.u32 4294901760, %v1711_v20 }
 0x228   :  { %3219 = vmatprep.subr.bf16.mxu1 %v4501_v0 }
 0x22b   :  { %3221 = vmatpush3.bf16.msra.mxu1 %v3967_v63  ;;  %v1713_v63 = vld [vmem:[#allocation10 + $0x30] sm:$0xff] }
 0x22c   :  { %3222 = vmatprep.subr.bf16.mxu1 %v4501_v0 }
 0x22f   :  { %3224 = vmatpush3.bf16.msra.mxu1 %v3977_v31  ;;  %v1714_v31 = vld [vmem:[#allocation10 + $0x38] sm:$0xff] }
 0x230   :  { %3225 = vmatprep.subr.bf16.mxu1 %v4501_v0  ;;  %v1745_v62 = vand.u32 4294901760, %v1714_v31 }
 0x232   :  { %v4140_v5 = vsub.f32 %v1714_v31, %v1745_v62 }
 0x233   :  { %3227 = vmatpush3.bf16.msra.mxu1 %v3985_v54  ;;  %v4107_v54 = vsub.f32 %v1707_v13, %v1724_v3 }
 0x234   :  { %3228 = vmatprep.subr.bf16.mxu1 %v4501_v0 }
 0x236   :  { %2756 = vmatmul.mubr.f32.vlgmr.msra.gmra.mrb[2].mxu1 %v4031_v48 }
 0x237   :  { %3230 = vmatpush3.bf16.msra.mxu1 %v3229_v55  ;;  %2790 = vmatprep.mubr.msk.f32.mxu1 %vm3687_vm0, %v4497_v1  ;;  %v4109_v55 = vsub.f32 %v1708_v50, %v1727_v6 }
 0x238   :  { %3231 = vmatprep.subr.bf16.mxu1 %v4501_v0 }
 0x239   :  { %v4495_v53 = vand.u32 4294901760, %v4109_v55 }
 0x23b   :  { %3233 = vmatpush3.bf16.msra.mxu1 %v3232_v2  ;;  %v4111_v2 = vsub.f32 %v1709_v59, %v1730_v14  ;;  %v1825_v18 = vsub.f32 %v4109_v55, %v4495_v53  ;;  %v4167_v53 = vld [vmem:[#allocation10 + $0x60] sm:$0xff] }
 0x23c   :  { %3234 = vmatprep.subr.bf16.mxu1 %v4501_v0 }
 0x23d   :  { %v4494_v11 = vand.u32 4294901760, %v4111_v2 }
 0x23f   :  { %3236 = vmatpush3.bf16.msra.mxu1 %v3235_v7  ;;  %v4113_v7 = vpack.c.bf16 %v1727_v6, %v1724_v3  ;;  %v1832_v21 = vsub.f32 %v4111_v2, %v4494_v11  ;;  %v1715_v3 = vld [vmem:[#allocation10 + $0x40] sm:$0xff]  ;;  %v4165_v11 = vld [vmem:[#allocation10 + $0x58] sm:$0xff] }
 0x240   :  { %3237 = vmatprep.subr.bf16.mxu1 %v4501_v0 }
 0x243   :  { %3239 = vmatpush3.bf16.msra.mxu1 %v3238_v8  ;;  %v4115_v8 = vsub.f32 %v1710_v12, %v1733_v46  ;;  %v1826_v12 = vand.u32 4294901760, %v1825_v18  ;;  %v4163_v18 = vpack.c.bf16 %v1733_v46, %v1730_v14  ;;  %v4510_v46 = vmov 0.0|0.0  }
 0x244   :  { %3240 = vmatprep.subr.bf16.mxu1 %v4501_v0 }
 0x245   :  { %v4492_v22 = vand.u32 4294901760, %v4115_v8 }
 0x247   :  { %3242 = vmatpush3.bf16.msra.mxu1 %v3241_v10  ;;  %v4117_v10 = vsub.f32 %v1711_v20, %v1736_v47  ;;  %v1839_v51 = vsub.f32 %v4115_v8, %v4492_v22  ;;  %v1833_v20 = vand.u32 4294901760, %v1832_v21  ;;  %v4157_v22 = vld [vmem:[#allocation10 + $0x50] sm:$0xff]  ;;  %v1748_v21 = vand.u32 4294901760, %v1715_v3 }
 0x248   :  { %3243 = vmatprep.subr.bf16.mxu1 %v4501_v0  ;;  %v4504_v14 = vand.u32 4294901760, %v4157_v22 }
 0x249   :  { %v4491_v57 = vand.u32 4294901760, %v4117_v10  ;;  %v1840_v31 = vand.u32 4294901760, %v1839_v51 }
 0x24b   :  { %3245 = vmatpush3.bf16.msra.mxu1 %v3244_v32  ;;  %v4119_v32 = vsub.f32 %v1712_v45, %v1739_v60  ;;  %v1846_v13 = vsub.f32 %v4117_v10, %v4491_v57  ;;  %v4503_v45 = vand.u32 4294901760, %v4140_v5  ;;  %v3370_v51 = vpack.c.bf16 %v1840_v31, %v1833_v20 }
 0x24c   :  { %3246 = vmatprep.subr.bf16.mxu1 %v4501_v0  ;;  %v4506_v20 = vand.u32 4294901760, %v4167_v53 }
 0x24d   :  { %v4493_v27 = vand.u32 4294901760, %v4119_v32 }
 0x24f   :  { %3248 = vmatpush3.bf16.msra.mxu1 %v3247_v38  ;;  %v1742_v38 = vand.u32 4294901760, %v1713_v63  ;;  %v1853_v50 = vsub.f32 %v4119_v32, %v4493_v27 }
 0x250   :  { %3249 = vmatprep.subr.bf16.mxu1 %v4501_v0 }
 0x251   :  { %v4128_v33 = vsub.f32 %v1713_v63, %v1742_v38  ;;  %v1716_v63 = vld [vmem:[#allocation10 + $0x48] sm:$0xff] }
 0x253   :  { %3251 = vmatpush3.bf16.msra.mxu1 %v3250_v52  ;;  %v4496_v52 = vand.u32 4294901760, %v4107_v54  ;;  %v4499_v59 = vand.u32 4294901760, %v4128_v33 }
 0x254   :  { %3252 = vmatprep.subr.bf16.mxu1 %v4501_v0 }
 0x255   :  { %v1818_v34 = vsub.f32 %v4107_v54, %v4496_v52  ;;  %v1860_v57 = vsub.f32 %v4128_v33, %v4499_v59  ;;  %v1847_v52 = vand.u32 4294901760, %v1846_v13  ;;  %v1751_v59 = vand.u32 4294901760, %v1716_v63 }
 0x256   :  { %2791 = vmatmul.mubr.f32.vlgmr.msra.gmra.mrb[2].mxu1 %v4035_v49  ;;  %v4505_v13 = vand.u32 4294901760, %v4165_v11 }
 0x257   :  { %3254 = vmatpush3.bf16.msra.mxu1 %v3840_v39  ;;  %2825 = vmatprep.mubr.msk.f32.mxu1 %vm3687_vm0, %v4497_v1  ;;  %v1819_v6 = vand.u32 4294901760, %v1818_v34  ;;  %v1867_v34 = vsub.f32 %v4140_v5, %v4503_v45  ;;  %v1854_v1 = vand.u32 4294901760, %v1853_v50  ;;  %v4178_v45 = vsub.f32 %v1716_v63, %v1751_v59 }
 0x258   :  { %3255 = vmatprep.subr.bf16.mxu1 %v4501_v0  ;;  %v4181_v50 = vpack.c.bf16 %v1745_v62, %v1742_v38  ;;  %v4196_v38 = vsub.f32 %v4165_v11, %v4505_v13  ;;  %v4201_v62 = vsub.f32 %v4167_v53, %v4506_v20  ;;  %v4203_v63 = vpack.c.bf16 %v1751_v59, %v1748_v21 }
 0x259   :  { %v3367_v27 = vpack.c.bf16 %v1826_v12, %v1819_v6  ;;  %v4171_v6 = vsub.f32 %v1715_v3, %v1748_v21  ;;  %v4173_v12 = vpack.c.bf16 %v1739_v60, %v1736_v47  ;;  %v4189_v60 = vsub.f32 %v4157_v22, %v4504_v14 }
 0x25a   :  { %v4509_v3 = vand.u32 4294901760, %v4178_v45  ;;  %v3373_v31 = vpack.c.bf16 %v1854_v1, %v1847_v52  ;;  %v4511_v20 = vand.u32 4294901760, %v3842_v40  ;;  %v4512_v59 = vand.u32 4294901760, %v3844_v41 }
 0x25b   :  { %3257 = vmatpush3.bf16.msra.mxu1 %v3851_v44  ;;  %3368 = vmatpush3.bf16.msra.mxu0 %v3367_v27  ;;  %v4507_v47 = vand.u32 4294901760, %v4171_v6  ;;  %v4508_v27 = vand.u32 4294901760, %v4169_v58  ;;  %v1894_v52 = vand.u32 4294901760, %v4196_v38  ;;  %v4513_v14 = vand.u32 4294901760, %v4035_v49 }
 0x25c   :  { %3258 = vmatprep.subr.bf16.mxu1 %v4501_v0  ;;  %3369 = vmatprep.subr.bf16.mxu0 %v4510_v46  ;;  %v3277_v21 = vpack.c.bf16 %v4512_v59, %v4511_v20  ;;  %v1881_v1 = vsub.f32 %v4178_v45, %v4509_v3  ;;  %v4514_v41 = vand.u32 4294901760, %v4189_v60  ;;  %v4517_v49 = vmov 0.0  }
 0x25d   :  { %v4212_v13 = vsub.f32 %v4169_v58, %v4508_v27  ;;  %v1901_v27 = vand.u32 4294901760, %v4201_v62  ;;  %v1895_v59 = vsub.f32 %v4196_v38, %v1894_v52 }
 0x25e   :  { %v1882_v40 = vand.u32 4294901760, %v1881_v1  ;;  %v1888_v20 = vsub.f32 %v4189_v60, %v4514_v41  ;;  %v4519_v41 = vand.u32 4294901760, %v3877_v16  ;;  %v4522_v16 = vand.u32 4294901760, %v3883_v23 }
 0x25f   :  { %3260 = vmatpush3.bf16.msra.mxu1 %v3859_v56  ;;  %3371 = vmatpush3.bf16.msra.mxu0 %v3370_v51  ;;  %v1908_v3 = vand.u32 4294901760, %v4212_v13  ;;  %v4526_v23 = vand.u32 4294901760, %v3893_v29 }
 0x260   :  { %3261 = vmatprep.subr.bf16.mxu1 %v4501_v0  ;;  %3372 = vmatprep.subr.bf16.mxu0 %v4510_v46  ;;  %v1889_v1 = vand.u32 4294901760, %v1888_v20  ;;  %v4521_v20 = vand.u32 4294901760, %v3881_v19  ;;  %v4525_v19 = vand.u32 4294901760, %v3889_v26 }
 0x263   :  { %3263 = vmatpush3.bf16.msra.mxu1 %v3863_v61  ;;  %3374 = vmatpush3.bf16.msra.mxu0 %v3373_v31 }
 0x264   :  { %3264 = vmatprep.subr.bf16.mxu1 %v4501_v0  ;;  %3375 = vmatprep.subr.bf16.mxu0 %v4510_v46 }
 0x267   :  { %3266 = vmatpush3.bf16.msra.mxu1 %v3867_v4 }
 0x268   :  { %3267 = vmatprep.subr.bf16.mxu1 %v4501_v0 }
 0x26b   :  { %3269 = vmatpush3.bf16.msra.mxu1 %v3871_v9 }
 0x26c   :  { %3270 = vmatprep.subr.bf16.mxu1 %v4501_v0  ;;  %v1861_v0 = vand.u32 4294901760, %v1860_v57  ;;  %v1868_v57 = vand.u32 4294901760, %v1867_v34  ;;  %v1874_v34 = vsub.f32 %v4171_v6, %v4507_v47 }
 0x26e   :  { %v3376_v51 = vpack.c.bf16 %v1868_v57, %v1861_v0  ;;  %v1875_v47 = vand.u32 4294901760, %v1874_v34  ;;  %v4515_v0 = vand.u32 4294901760, %v3846_v42  ;;  %v4516_v57 = vand.u32 4294901760, %v3848_v43 }
 0x26f   :  { %3272 = vmatpush3.bf16.msra.mxu1 %v3891_v28  ;;  %v1909_v42 = vsub.f32 %v4212_v13, %v1908_v3  ;;  %v4518_v43 = vand.u32 4294901760, %v3875_v15 }
 0x270   :  { %3273 = vmatprep.subr.bf16.mxu1 %v4510_v46  ;;  %v3280_v34 = vpack.c.bf16 %v4516_v57, %v4515_v0  ;;  %3377 = vmatpush3.bf16.msra.mxu0 %v3376_v51  ;;  %v3379_v31 = vpack.c.bf16 %v1882_v40, %v1875_v47  ;;  %v4520_v40 = vand.u32 4294901760, %v3879_v17  ;;  %v4524_v17 = vand.u32 4294901760, %v3887_v25 }
 0x271   :  { %v3283_v0 = vpack.c.bf16 %v4519_v41, %v4518_v43  ;;  %3378 = vmatprep.subr.bf16.mxu0 %v4510_v46  ;;  %v1910_v47 = vand.u32 4294901760, %v1909_v42  ;;  %v4529_v25 = vand.u32 4294901760, %v3905_v37  ;;  %v4530_v41 = vand.u32 4294901760, %v4157_v22 }
 0x273   :  { %3275 = vmatpush3.bf16.msra.mxu1 %v3903_v36 }
 0x274   :  { %3276 = vmatprep.subr.bf16.mxu1 %v4510_v46  ;;  %3380 = vmatpush3.bf16.msra.mxu0 %v3379_v31 }
 0x275   :  { %3381 = vmatprep.subr.bf16.mxu0 %v4510_v46 }
 0x276   :  { %2826 = vmatmul.mubr.f32.vlgmr.msra.gmra.mrb[2].mxu1 %v4513_v14  ;;  %v1902_v14 = vsub.f32 %v4201_v62, %v1901_v27 }
 0x277   :  { %3278 = vmatpush3.bf16.msra.mxu1 %v3277_v21  ;;  %2860 = vmatprep.mubr.msk.f32.mxu1 %vm3687_vm0, %v4517_v49  ;;  %v1896_v21 = vand.u32 4294901760, %v1895_v59  ;;  %v3286_v59 = vpack.c.bf16 %v4521_v20, %v4520_v40 }
 0x278   :  { %3279 = vmatprep.subr.bf16.mxu1 %v4510_v46  ;;  %v1903_v51 = vand.u32 4294901760, %v1902_v14  ;;  %v3292_v14 = vpack.c.bf16 %v4525_v19, %v4524_v17  ;;  %v3397_v19 = vpack.c.bf16 %v4119_v32, %v4117_v10 }
 0x279   :  { %v3382_v57 = vpack.c.bf16 %v1896_v21, %v1889_v1  ;;  %v4528_v21 = vand.u32 4294901760, %v3900_v35 }
 0x27a   :  { %v3385_v15 = vpack.c.bf16 %v1910_v47, %v1903_v51  ;;  %v4532_v51 = vand.u32 4294901760, %v4167_v53  ;;  %v4533_v47 = vand.u32 4294901760, %v4169_v58  ;;  %v3391_v53 = vpack.c.bf16 %v4109_v55, %v4107_v54 }
 0x27b   :  { %3281 = vmatpush3.bf16.msra.mxu1 %v3280_v34  ;;  %3383 = vmatpush3.bf16.msra.mxu0 %v3382_v57  ;;  %v4523_v34 = vand.u32 4294901760, %v3885_v24  ;;  %v4527_v24 = vand.u32 4294901760, %v3895_v30  ;;  %v3298_v42 = vpack.c.bf16 %v4529_v25, %v4528_v21  ;;  %v3409_v21 = vpack.c.bf16 %v4212_v13, %v4201_v62 }
 0x27c   :  { %3282 = vmatprep.subr.bf16.mxu1 %v4510_v46  ;;  %3384 = vmatprep.subr.bf16.mxu0 %v4510_v46  ;;  %v4341_v40 = vpack.c.bf16 %v4533_v47, %v4532_v51  ;;  %v4534_v25 = vand.u32 4294901760, %v4107_v54  ;;  %v4538_v54 = vand.u32 4294901760, %v4117_v10  ;;  %v4544_v10 = vand.u32 4294901760, %v4189_v60 }
 0x27d   :  { %v3289_v31 = vpack.c.bf16 %v4523_v34, %v4522_v16  ;;  %v3295_v1 = vpack.c.bf16 %v4527_v24, %v4526_v23  ;;  %v3394_v34 = vpack.c.bf16 %v4115_v8, %v4111_v2  ;;  %v3400_v23 = vpack.c.bf16 %v4140_v5, %v4128_v33 }
 0x27e   :  { %v3403_v24 = vpack.c.bf16 %v4178_v45, %v4171_v6 }
 0x27f   :  { %3284 = vmatpush3.bf16.msra.mxu1 %v3283_v0  ;;  %3386 = vmatpush3.bf16.msra.mxu0 %v3385_v15  ;;  %v4531_v0 = vand.u32 4294901760, %v4165_v11 }
 0x280   :  { %3285 = vmatprep.subr.bf16.mxu1 %v4510_v46  ;;  %3387 = vmatprep.subr.bf16.mxu0 %v4510_v46 }
 0x281   :  { %v4332_v57 = vpack.c.bf16 %v4531_v0, %v4530_v41 }
 0x283   :  { %3287 = vmatpush3.bf16.msra.mxu1 %v3286_v59 }
 0x284   :  { %3288 = vmatprep.subr.bf16.mxu1 %v4510_v46 }
 0x287   :  { %3290 = vmatpush3.bf16.msra.mxu1 %v3289_v31 }
 0x288   :  { %3291 = vmatprep.subr.bf16.mxu1 %v4510_v46 }
 0x28b   :  { %3293 = vmatpush3.bf16.msra.mxu1 %v3292_v14 }
 0x28c   :  { %3294 = vmatprep.subr.bf16.mxu1 %v4510_v46 }
 0x28f   :  { %3296 = vmatpush3.bf16.msra.mxu1 %v3295_v1  ;;  %v3406_v1 = vpack.c.bf16 %v4196_v38, %v4189_v60 }
 0x290   :  { %3297 = vmatprep.subr.bf16.mxu1 %v4510_v46 }
 0x293   :  { %3299 = vmatpush3.bf16.msra.mxu1 %v3298_v42  ;;  %v4535_v42 = vand.u32 4294901760, %v4109_v55  ;;  %v4539_v55 = vand.u32 4294901760, %v4119_v32  ;;  %v3454_v32 = vpack.c.bf16 %v1894_v52, %v4544_v10 }
 0x294   :  { %3300 = vmatprep.subr.bf16.mxu1 %v4510_v46 }
 0x296   :  { %2861 = vmatmul.mubr.f32.vlgmr.msra.gmra.mrb[2].mxu1 %v4031_v48 }
 0x297   :  { %3302 = vmatpush3.bf16.msra.mxu1 %v3840_v39  ;;  %2895 = vmatprep.mubr.msk.f32.mxu1 %vm3687_vm0, %v4517_v49  ;;  %v1702_v39 = vpop.f32.mrb[2].mxu0 }
 0x298   :  { %3303 = vmatprep.subr.bf16.mxu1 %v4510_v46 }
 0x29b   :  { %3305 = vmatpush3.bf16.msra.mxu1 %v3851_v44  ;;  %v2951_v44 = vpop.f32.mrb[3].mxu0 }
 0x29c   :  { %3306 = vmatprep.subr.bf16.mxu1 %v4510_v46  ;;  %v4536_v44 = vand.u32 4294901760, %v4111_v2  ;;  %v4541_v2 = vand.u32 4294901760, %v4140_v5 }
 0x29f   :  { %3308 = vmatpush3.bf16.msra.mxu1 %v3859_v56  ;;  %v1721_v56 = vld [vmem:[#allocation10 + $0x70] sm:$0xff] }
 0x2a0   :  { %3309 = vmatprep.subr.bf16.mxu1 %v4510_v46 }
 0x2a3   :  { %3311 = vmatpush3.bf16.msra.mxu1 %v3863_v61  ;;  %v1722_v61 = vld [vmem:[#allocation10 + $0x78] sm:$0xff] }
 0x2a4   :  { %3312 = vmatprep.subr.bf16.mxu1 %v4510_v46 }
 0x2a7   :  { %3314 = vmatpush3.bf16.msra.mxu1 %v3867_v4  ;;  %v1766_v4 = vand.u32 4294901760, %v1721_v56 }
 0x2a8   :  { %3315 = vmatprep.subr.bf16.mxu1 %v4510_v46 }
 0x2a9   :  { %v4316_v26 = vsub.f32 %v1721_v56, %v1766_v4  ;;  %v4537_v56 = vand.u32 4294901760, %v4115_v8 }
 0x2ab   :  { %3317 = vmatpush3.bf16.msra.mxu1 %v3871_v9  ;;  %v1769_v9 = vand.u32 4294901760, %v1722_v61  ;;  %v1915_v29 = vand.u32 4294901760, %v4316_v26 }
 0x2ac   :  { %3318 = vmatprep.subr.bf16.mxu1 %v4510_v46 }
 0x2ad   :  { %v1916_v35 = vsub.f32 %v4316_v26, %v1915_v29  ;;  %v4345_v11 = vpack.c.bf16 %v1769_v9, %v1766_v4  ;;  %v3445_v4 = vpack.c.bf16 %v4539_v55, %v4538_v54 }
 0x2af   :  { %3320 = vmatpush3.bf16.msra.mxu1 %v3891_v28  ;;  %v4318_v28 = vsub.f32 %v1722_v61, %v1769_v9  ;;  %v1917_v37 = vand.u32 4294901760, %v1916_v35  ;;  %v3442_v61 = vpack.c.bf16 %v4537_v56, %v4536_v44  ;;  %v4540_v9 = vand.u32 4294901760, %v4128_v33 }
 0x2b0   :  { %3321 = vmatprep.subr.bf16.mxu1 %v4510_v46  ;;  %v4542_v35 = vand.u32 4294901760, %v4171_v6  ;;  %v3457_v33 = vpack.c.bf16 %v1908_v3, %v1901_v27 }
 0x2b1   :  { %v1922_v30 = vand.u32 4294901760, %v4318_v28  ;;  %v3412_v22 = vpack.c.bf16 %v4318_v28, %v4316_v26  ;;  %v3448_v8 = vpack.c.bf16 %v4541_v2, %v4540_v9 }
 0x2b3   :  { %3323 = vmatpush3.bf16.msra.mxu1 %v3903_v36  ;;  %v1923_v36 = vsub.f32 %v4318_v28, %v1922_v30  ;;  %v3460_v5 = vpack.c.bf16 %v1922_v30, %v1915_v29 }
 0x2b4   :  { %3342 = vmatprep.subr.bf16.mxu1 %v4510_v46 }
 0x2b6   :  { %2896 = vmatmul.mubr.f32.vlgmr.msra.gmra.mrb[2].mxu1 %v4031_v48  ;;  %v1924_v48 = vand.u32 4294901760, %v1923_v36  ;;  %v4543_v36 = vand.u32 4294901760, %v4178_v45 }
 0x2b7   :  { %3344 = vmatpush3.bf16.msra.mxu1 %v4113_v7  ;;  %2984 = vmatprep.mubr.msk.f32.mxu1 %vm3687_vm0, %v4517_v49 }
 0x2b8   :  { %3345 = vmatprep.subr.bf16.mxu1 %v4510_v46  ;;  %v3388_v43 = vpack.c.bf16 %v1924_v48, %v1917_v37  ;;  %v3451_v37 = vpack.c.bf16 %v4543_v36, %v4542_v35 }
 0x2ba   :  { %3389 = vmatpush3.bf16.msra.mxu0 %v3388_v43 }
 0x2bb   :  { %3347 = vmatpush3.bf16.msra.mxu1 %v4163_v18  ;;  %3390 = vmatprep.subr.bf16.mxu0 %v4510_v46 }
 0x2bc   :  { %3348 = vmatprep.subr.bf16.mxu1 %v4510_v46 }
 0x2bf   :  { %3350 = vmatpush3.bf16.msra.mxu1 %v4173_v12 }
 0x2c0   :  { %3351 = vmatprep.subr.bf16.mxu1 %v4510_v46 }
 0x2c3   :  { %3353 = vmatpush3.bf16.msra.mxu1 %v4181_v50 }
 0x2c4   :  { %3354 = vmatprep.subr.bf16.mxu1 %v4510_v46 }
 0x2c7   :  { %3356 = vmatpush3.bf16.msra.mxu1 %v4203_v63 }
 0x2c8   :  { %3357 = vmatprep.subr.bf16.mxu1 %v4510_v46 }
 0x2cb   :  { %3359 = vmatpush3.bf16.msra.mxu1 %v4332_v57 }
 0x2cc   :  { %3360 = vmatprep.subr.bf16.mxu1 %v4510_v46 }
 0x2cf   :  { %3362 = vmatpush3.bf16.msra.mxu1 %v4341_v40 }
 0x2d0   :  { %3363 = vmatprep.subr.bf16.mxu1 %v4510_v46 }
 0x2d3   :  { %3365 = vmatpush3.bf16.msra.mxu1 %v4345_v11 }
 0x389   :  { %v1227_v20 = vpop.f32.mrb[2].mxu1 }
 0x38a   :  { %v1706_v59 = vmul.f32 %v1702_v39, %v1227_v20  ;;  %v2897_v15 = vpop.f32.mrb[3].mxu1  ;;  %v3439_v39 = vpack.c.bf16 %v4535_v42, %v4534_v25 }
 0x38c   :  { %v4352_v58 = vand.u32 4294901760, %v1706_v59 }
 0x38e   :  { %v1805_v16 = vsub.f32 %v1706_v59, %v4352_v58  ;;  %3020 = vmatmul.mubr.f32.vlgmr.msra.gmra.mrb[4].mxu0 %v4352_v58 }
 0x38f   :  { %3392 = vmatpush3.bf16.msra.mxu0 %v3391_v53  ;;  %3054 = vmatprep.mubr.msk.f32.mxu0 %vm3687_vm0, %v4517_v49 }
 0x390   :  { %v1806_v31 = vand.u32 4294901760, %v1805_v16  ;;  %3393 = vmatprep.subr.bf16.mxu0 %v4510_v46 }
 0x392   :  { %v1807_v17 = vsub.f32 %v1805_v16, %v1806_v31 }
 0x393   :  { %3395 = vmatpush3.bf16.msra.mxu0 %v3394_v34 }
 0x394   :  { %3396 = vmatprep.subr.bf16.mxu0 %v4510_v46  ;;  %v1808_v14 = vand.u32 4294901760, %v1807_v17 }
 0x396   :  { %2985 = vmatmul.mubr.f32.vlgmr.msra.gmra.mrb[4].mxu1 %v1808_v14 }
 0x397   :  { %3398 = vmatpush3.bf16.msra.mxu0 %v3397_v19 }
 0x398   :  { %3399 = vmatprep.subr.bf16.mxu0 %v4510_v46 }
 0x39b   :  { %3401 = vmatpush3.bf16.msra.mxu0 %v3400_v23 }
 0x39c   :  { %3402 = vmatprep.subr.bf16.mxu0 %v4510_v46 }
 0x39f   :  { %3404 = vmatpush3.bf16.msra.mxu0 %v3403_v24 }
 0x3a0   :  { %3405 = vmatprep.subr.bf16.mxu0 %v4510_v46 }
 0x3a3   :  { %3407 = vmatpush3.bf16.msra.mxu0 %v3406_v1 }
 0x3a4   :  { %3408 = vmatprep.subr.bf16.mxu0 %v4510_v46 }
 0x3a7   :  { %3410 = vmatpush3.bf16.msra.mxu0 %v3409_v21 }
 0x3a8   :  { %3411 = vmatprep.subr.bf16.mxu0 %v4510_v46 }
 0x3ab   :  { %3413 = vmatpush3.bf16.msra.mxu0 %v3412_v22 }
 0x3ac   :  { %3414 = vmatprep.subr.bf16.mxu0 %v4510_v46 }
 0x3ae   :  { %3055 = vmatmul.mubr.f32.vlgmr.msra.gmra.mrb[4].mxu0 %v1805_v16 }
 0x3af   :  { %3416 = vmatpush3.bf16.msra.mxu0 %v4113_v7  ;;  %3089 = vmatprep.mubr.msk.f32.mxu0 %vm3687_vm0, %v4517_v49 }
 0x3b0   :  { %3417 = vmatprep.subr.bf16.mxu0 %v4510_v46 }
 0x3b3   :  { %3419 = vmatpush3.bf16.msra.mxu0 %v4163_v18 }
 0x3b4   :  { %3420 = vmatprep.subr.bf16.mxu0 %v4510_v46 }
 0x3b7   :  { %3422 = vmatpush3.bf16.msra.mxu0 %v4173_v12 }
 0x3b8   :  { %3423 = vmatprep.subr.bf16.mxu0 %v4510_v46 }
 0x3bb   :  { %3425 = vmatpush3.bf16.msra.mxu0 %v4181_v50 }
 0x3bc   :  { %3426 = vmatprep.subr.bf16.mxu0 %v4510_v46 }
 0x3bf   :  { %3428 = vmatpush3.bf16.msra.mxu0 %v4203_v63 }
 0x3c0   :  { %3429 = vmatprep.subr.bf16.mxu0 %v4510_v46 }
 0x3c3   :  { %3431 = vmatpush3.bf16.msra.mxu0 %v4332_v57 }
 0x3c4   :  { %3432 = vmatprep.subr.bf16.mxu0 %v4510_v46 }
 0x3c7   :  { %3434 = vmatpush3.bf16.msra.mxu0 %v4341_v40 }
 0x3c8   :  { %3435 = vmatprep.subr.bf16.mxu0 %v4510_v46 }
 0x3cb   :  { %3437 = vmatpush3.bf16.msra.mxu0 %v4345_v11 }
 0x3cc   :  { %3438 = vmatprep.subr.bf16.mxu0 %v4510_v46 }
 0x3ce   :  { %3090 = vmatmul.mubr.f32.vlgmr.msra.gmra.mrb[4].mxu0 %v1806_v31 }
 0x3cf   :  { %3440 = vmatpush3.bf16.msra.mxu0 %v3439_v39  ;;  %3124 = vmatprep.mubr.msk.f32.mxu0 %vm3687_vm0, %v4517_v49 }
 0x3d0   :  { %3441 = vmatprep.subr.bf16.mxu0 %v4510_v46 }
 0x3d3   :  { %3443 = vmatpush3.bf16.msra.mxu0 %v3442_v61 }
 0x3d4   :  { %3444 = vmatprep.subr.bf16.mxu0 %v4510_v46 }
 0x3d7   :  { %3446 = vmatpush3.bf16.msra.mxu0 %v3445_v4 }
 0x3d8   :  { %3447 = vmatprep.subr.bf16.mxu0 %v4510_v46 }
 0x3db   :  { %3449 = vmatpush3.bf16.msra.mxu0 %v3448_v8 }
 0x3dc   :  { %3450 = vmatprep.subr.bf16.mxu0 %v4510_v46 }
 0x3df   :  { %3452 = vmatpush3.bf16.msra.mxu0 %v3451_v37 }
 0x3e0   :  { %3453 = vmatprep.subr.bf16.mxu0 %v4510_v46 }
 0x3e3   :  { %3455 = vmatpush3.bf16.msra.mxu0 %v3454_v32 }
 0x3e4   :  { %3456 = vmatprep.subr.bf16.mxu0 %v4510_v46 }
 0x3e7   :  { %3458 = vmatpush3.bf16.msra.mxu0 %v3457_v33 }
 0x3e8   :  { %3459 = vmatprep.subr.bf16.mxu0 %v4510_v46 }
 0x3eb   :  { %3461 = vmatpush3.bf16.msra.mxu0 %v3460_v5 }
 0x3ec   :  { %3462 = vmatprep.subr.bf16.mxu0 %v4510_v46 }
 0x3ee   :  { %3125 = vmatmul.mubr.f32.vlgmr.msra.gmra.mrb[4].mxu0 %v4352_v58 }
 0x3ef   :  { %3464 = vmatpush3.bf16.msra.mxu0 %v4113_v7  ;;  %3159 = vmatprep.mubr.msk.f32.mxu0 %vm3687_vm0, %v4517_v49 }
 0x3f0   :  { %3465 = vmatprep.subr.bf16.mxu0 %v4510_v46 }
 0x3f3   :  { %3467 = vmatpush3.bf16.msra.mxu0 %v4163_v18 }
 0x3f4   :  { %3468 = vmatprep.subr.bf16.mxu0 %v4510_v46 }
 0x3f7   :  { %3470 = vmatpush3.bf16.msra.mxu0 %v4173_v12 }
 0x3f8   :  { %3471 = vmatprep.subr.bf16.mxu0 %v4510_v46 }
 0x3fb   :  { %3473 = vmatpush3.bf16.msra.mxu0 %v4181_v50 }
 0x3fc   :  { %3474 = vmatprep.subr.bf16.mxu0 %v4510_v46 }
 0x3ff   :  { %3476 = vmatpush3.bf16.msra.mxu0 %v4203_v63 }
 0x400   :  { %3477 = vmatprep.subr.bf16.mxu0 %v4510_v46 }
 0x403   :  { %3479 = vmatpush3.bf16.msra.mxu0 %v4332_v57 }
 0x404   :  { %3480 = vmatprep.subr.bf16.mxu0 %v4510_v46 }
 0x407   :  { %3482 = vmatpush3.bf16.msra.mxu0 %v4341_v40 }
 0x408   :  { %3483 = vmatprep.subr.bf16.mxu0 %v4510_v46 }
 0x40b   :  { %3485 = vmatpush3.bf16.msra.mxu0 %v4345_v11 }
 0x40e   :  { %3160 = vmatmul.mubr.f32.vlgmr.msra.gmra.mrb[4].mxu0 %v4352_v58 }
 0x469   :  { %v1810_v7 = vpop.f32.mrb[4].mxu1 }
 0x46a   :  { %v2986_v45 = vpop.f32.mrb[5].mxu1 }
 0x4e1   :  { %v2360_v18 = vpop.f32.mrb[4].mxu0 }
 0x4e2   :  { %v3487_v6 = vadd.f32 %v2360_v18, %v1810_v7  ;;  %v3161_v12 = vpop.f32.mrb[5].mxu0 }
 0x4e4   :  { %2364 = vst [vmem:[#allocation11] sm:$0xff] %v3487_v6 }
 0x4e5   :  { %3660 = shalt.err (!%p3657_p2)
}
 0x4e6   :  { %s3661_s30 = scalar_lea.hbm %s4474_s5, 128 }
 0x4e7   :  { %p3662_p3 = scmp.ne.s32.totalorder %s4474_s5, %s3661_s30  ;;  %p3665_p4 = scmp.lt.u32.totalorder %s3661_s30, %s4474_s5 }
 0x4e9   :  { %p3667_p5 = pnand %p3665_p4, %p3662_p3 }
 0x4eb   :  { %3670 = shalt.err (!%p3667_p5)
}
 0x4ec   :  { %2374 = dma.vmem_to_hbm [thread:$0]  %s2372_s28, 128, %s4474_s5, [#allocation4]  }
 0x4ed   :  { %3677 = dma.done.wait [#allocation4], 128  }
 0x4ee   :  { %3678 = vsyncadd [#allocation4], 4294967168 }
 0x4ef   :  { %2378 = vsyncpa [#allocation3], 1 }
 0x4f0   :  { %2379 = vsyncpa [#allocation6], 1 }
 0x4f1   :  { %2380 = vsyncpa [#allocation9], 1 }
 0x4f2   :  { %2381 = vsyncpa [#allocation4], 1 }

</bundles_post_ra>
